<compile_context>
chip_gen: v5e
topology: v5e:2x2
jax: 0.10.0
libtpu: 0.0.40
codegen_flags: <defaults>
</compile_context>

<pallas_src>
import functools

import jax
import jax.numpy as jnp
from jax.experimental import pallas as pl
from jax.experimental.pallas import tpu as pltpu

EPS = 1e-5
CPAD = 128  # lane-dense channel padding (vreg lane width)


def fused_conv_branch_kernel(xp_ref, w_ref, g_ref, b_ref, o_ref, *scratch,
                             L, K, num_layers, top):
    """Fused (Conv1d -> BatchNorm1d(train) -> ReLU) x num_layers.

    xp_ref : (N, top + L + pad, CPAD) bf16  zero-padded input, NLC layout
    w_ref  : (num_layers, K*CPAD, CPAD) bf16  weights, tap-major / cin-minor
    g_ref  : (num_layers, 1, CPAD) f32  BN gamma (zero in padded channels)
    b_ref  : (num_layers, 1, CPAD) f32  BN beta  (zero in padded channels)
    o_ref  : (N, L, CPAD) bf16  output, NLC layout
    scratch: optional (N, top + L + pad, CPAD) bf16 inter-layer activations
    """
    act_ref = scratch[0] if scratch else None
    N = xp_ref.shape[0]
    pad = K // 2
    inv_cnt = 1.0 / float(N * L)

    # Zero ONLY the halo rows of the inter-layer buffer; the interior is fully
    # overwritten every layer.  Top halo is 8-row aligned (top % 8 == 0).
    if act_ref is not None and pad > 0:
        act_ref[:, :top, :] = jnp.zeros((N, top, CPAD), act_ref.dtype)
        act_ref[:, top + L:, :] = jnp.zeros((N, pad, CPAD), act_ref.dtype)

    y = None
    for l in range(num_layers):
        src = xp_ref if l == 0 else act_ref

        # Conv as K accumulating depth-CPAD matmuls on the MXU (bf16 in,
        # f32 accumulation).  Weight slices are static, sublane-aligned.
        acc = None
        for k in range(K):
            r0 = top - pad + k
            part = jax.lax.dot_general(
                src[:, r0:r0 + L, :],
                w_ref[l, k * CPAD:(k + 1) * CPAD, :],
                (((2,), (0,)), ((), ())),
                preferred_element_type=jnp.float32)           # (N, L, CPAD) f32
            acc = part if acc is None else acc + part

        # BatchNorm1d, training-mode biased stats over (N, L).  Two-pass
        # (mean-subtracted) variance for stability; the centered temp is only
        # live for the reduction.  Conv bias is omitted: it cancels exactly
        # under the batch-mean subtraction.  Folded scale/shift + ReLU.
        mean = jnp.sum(acc, axis=(0, 1), keepdims=True) * inv_cnt
        cen = acc - mean
        var = jnp.sum(cen * cen, axis=(0, 1), keepdims=True) * inv_cnt
        scale = g_ref[l][None, :, :] * jax.lax.rsqrt(var + EPS)
        shift = b_ref[l][None, :, :] - mean * scale
        y = jnp.maximum(acc * scale + shift, 0.0)

        if l + 1 < num_layers:
            act_ref[:, top:top + L, :] = y.astype(act_ref.dtype)

    o_ref[...] = y.astype(o_ref.dtype)


def _prepare_params(params, K):
    """PyTorch-layout params -> stacked, channel-padded, bf16 kernel operands."""
    w_list, g_list, b_list = [], [], []
    for (w_pt, _bias, gamma, beta) in params:
        out_ch, in_ch, k = w_pt.shape
        assert k == K
        w = jnp.transpose(w_pt, (2, 1, 0))                    # (K, Cin, Cout)
        w = jnp.pad(w, ((0, 0), (0, CPAD - in_ch), (0, CPAD - out_ch)))
        w_list.append(w.reshape(K * CPAD, CPAD))              # tap-major, cin-minor
        g_list.append(jnp.pad(gamma, (0, CPAD - out_ch)))     # padded chans -> 0
        b_list.append(jnp.pad(beta, (0, CPAD - out_ch)))
        # _bias (conv bias) is intentionally dropped: training-mode BN removes
        # any per-channel constant offset exactly.  NOT valid for eval-mode BN.
    w_all = jnp.stack(w_list).astype(jnp.bfloat16)            # (Ln, K*CPAD, CPAD)
    g_all = jnp.stack(g_list)[:, None, :].astype(jnp.float32)  # (Ln, 1, CPAD)
    b_all = jnp.stack(b_list)[:, None, :].astype(jnp.float32)
    return w_all, g_all, b_all


def conv_branch_forward(x_ncl, params, kernel_size):
    """ConvBranch.forward: x is NCL like PyTorch's Conv1d input.

    Assumes training-mode BatchNorm1d (batch statistics); the conv bias is
    folded away under that assumption.
    """
    N, Cin, L = x_ncl.shape
    K = kernel_size
    num_layers = len(params)
    Cout = params[-1][0].shape[0]
    pad = K // 2
    top = ((pad + 7) // 8) * 8 if pad > 0 else 0   # sublane-aligned top halo

    w_all, g_all, b_all = _prepare_params(params, K)

    # NCL -> NLC, pad ONCE (aligned top halo + bottom halo + channels to 128
    # lanes), cast to bf16.
    xp = jnp.transpose(x_ncl, (0, 2, 1))
    xp = jnp.pad(xp, ((0, 0), (top, pad), (0, CPAD - Cin))).astype(jnp.bfloat16)

    # Advisory cost estimate (real, unpadded flop counts).
    flops = 0
    for (w_pt, _, _, _) in params:
        o_ch, i_ch, k = w_pt.shape
        flops += 2 * N * L * k * i_ch * o_ch

    rows = top + L + pad
    bytes_in = int(N * rows * CPAD * 2 + w_all.size * 2 +
                   g_all.size * 4 + b_all.size * 4)
    bytes_out = int(N * L * CPAD * 2)
    bytes_scratch = int(N * rows * CPAD * 2) if num_layers > 1 else 0
    bytes_accessed = bytes_in + bytes_out

    # VMEM budget derived from actual buffer sizes (2x for compiler temps)
    # plus headroom; capped below v7x's 64 MiB physical VMEM.
    vmem_limit = min(56 * 1024 * 1024,
                     max(8 * 1024 * 1024,
                         2 * (bytes_in + bytes_out + bytes_scratch) + (4 << 20)))

    scratch_shapes = []
    if num_layers > 1:
        scratch_shapes.append(pltpu.VMEM((N, rows, CPAD), jnp.bfloat16))

    kern = functools.partial(fused_conv_branch_kernel,
                             L=L, K=K, num_layers=num_layers, top=top)
    vmem = pl.BlockSpec(memory_space=pltpu.MemorySpace.VMEM)
    out = pl.pallas_call(
        kern,
        out_shape=jax.ShapeDtypeStruct((N, L, CPAD), jnp.bfloat16),
        in_specs=[vmem, vmem, vmem, vmem],
        out_specs=vmem,
        scratch_shapes=scratch_shapes,
        cost_estimate=pl.CostEstimate(
            flops=flops,
            transcendentals=num_layers * CPAD,
            bytes_accessed=bytes_accessed),
        compiler_params=pltpu.CompilerParams(vmem_limit_bytes=vmem_limit),
    )(xp, w_all, g_all, b_all)

    # Strip channel padding, NLC -> NCL, back to f32 (module's working dtype).
    return jnp.transpose(out[:, :, :Cout], (0, 2, 1)).astype(jnp.float32)


def ref_forward(x_ncl, params, kernel_size):
    """Pure-JAX f32 reference with exact PyTorch semantics (incl. conv bias)."""
    h = x_ncl
    pad = kernel_size // 2
    for (w, b, g, be) in params:                              # w: (Cout, Cin, K)
        h = jax.lax.conv_general_dilated(
            h, w, (1,), [(pad, pad)],
            dimension_numbers=("NCH", "OIH", "NCH"))
        h = h + b[None, :, None]
        mean = jnp.mean(h, axis=(0, 2), keepdims=True)
        var = jnp.mean((h - mean) ** 2, axis=(0, 2), keepdims=True)
        h = (h - mean) * jax.lax.rsqrt(var + EPS)
        h = h * g[None, :, None] + be[None, :, None]
        h = jnp.maximum(h, 0.0)
    return h


if __name__ == "__main__":
    # ConvBranch defaults: input_channels=32, conv_channels=64, kernel_size=5,
    # num_layers=2; small batch/length for the check.
    N, Cin, L = 2, 32, 16
    Cconv, K, num_layers = 64, 5, 2

    key = jax.random.PRNGKey(0)
    keys = jax.random.split(key, 1 + 2 * num_layers)
    x = jax.random.normal(keys[0], (N, Cin, L), jnp.float32)

    # Deterministic PyTorch-style init (uniform conv weights/bias, BN gamma=1/beta=0).
    params = []
    in_ch = Cin
    for i in range(num_layers):
        out_ch = Cconv
        bound = 1.0 / (in_ch * K) ** 0.5
        w_pt = jax.random.uniform(keys[1 + 2 * i], (out_ch, in_ch, K),
                                  jnp.float32, -bound, bound)
        b = jax.random.uniform(keys[2 + 2 * i], (out_ch,),
                               jnp.float32, -bound, bound)
        gamma = jnp.ones((out_ch,), jnp.float32)
        beta = jnp.zeros((out_ch,), jnp.float32)
        params.append((w_pt, b, gamma, beta))
        in_ch = out_ch

    out = jax.block_until_ready(conv_branch_forward(x, params, kernel_size=K))
    assert out.shape == (N, Cconv, L), out.shape

    ref = ref_forward(x, params, kernel_size=K)
    # Tolerance accounts for bf16 MXU inputs (f32-accumulated), per-layer error
    # compounding, and the bf16 output writeback vs the f32 reference.
    max_err = float(jnp.max(jnp.abs(out - ref)))
    assert jnp.allclose(out, ref, atol=5e-2, rtol=5e-2), max_err

    print("KERNEL_OK")
</pallas_src>

<mosaic_0001>
module attributes {stable_mosaic.version = 11 : i64} {
  func.func @fused_conv_branch_kernel(%arg0: memref<2x26x128xbf16, #tpu.memory_space<vmem>>, %arg1: memref<2x640x128xbf16, #tpu.memory_space<vmem>>, %arg2: memref<2x1x128xf32, #tpu.memory_space<vmem>>, %arg3: memref<2x1x128xf32, #tpu.memory_space<vmem>>, %arg4: memref<2x16x128xbf16, #tpu.memory_space<vmem>>, %arg5: memref<2x26x128xbf16, #tpu.memory_space<vmem>>) attributes {dimension_semantics = [], scalar_prefetch = 0 : i64, scratch_operands = 1 : i64, tpu.core_type = #tpu.core_type<tc>} {
    %cst = arith.constant 0.000000e+00 : bf16
    %0 = vector.broadcast %cst : bf16 to vector<2x8x128xbf16>
    %c0 = arith.constant 0 : index
    %c0_0 = arith.constant 0 : index
    %c0_1 = arith.constant 0 : index
    %1 = vector.load %arg5[%c0, %c0_0, %c0_1] : memref<2x26x128xbf16, #tpu.memory_space<vmem>>, vector<2x8x128xbf16>
    tpu.vector_store %arg5[%c0, %c0_0, %c0_1], %0 {strides = array<i32>} : memref<2x26x128xbf16, #tpu.memory_space<vmem>>, vector<2x8x128xbf16>,
    %cst_2 = arith.constant 0.000000e+00 : bf16
    %2 = vector.broadcast %cst_2 : bf16 to vector<2x2x128xbf16>
    %c0_3 = arith.constant 0 : index
    %c24 = arith.constant 24 : index
    %c0_4 = arith.constant 0 : index
    %3 = vector.load %arg5[%c0_3, %c24, %c0_4] : memref<2x26x128xbf16, #tpu.memory_space<vmem>>, vector<2x2x128xbf16>
    tpu.vector_store %arg5[%c0_3, %c24, %c0_4], %2 {strides = array<i32>} : memref<2x26x128xbf16, #tpu.memory_space<vmem>>, vector<2x2x128xbf16>,
    %c0_5 = arith.constant 0 : index
    %c6 = arith.constant 6 : index
    %c0_6 = arith.constant 0 : index
    %4 = vector.load %arg0[%c0_5, %c6, %c0_6] : memref<2x26x128xbf16, #tpu.memory_space<vmem>>, vector<2x16x128xbf16>
    %c0_7 = arith.constant 0 : index
    %c0_8 = arith.constant 0 : index
    %c0_9 = arith.constant 0 : index
    %5 = vector.load %arg1[%c0_7, %c0_8, %c0_9] : memref<2x640x128xbf16, #tpu.memory_space<vmem>>, vector<1x128x128xbf16>
    %6 = vector.shape_cast %5 : vector<1x128x128xbf16> to vector<128x128xbf16>
    %cst_10 = arith.constant dense<0.000000e+00> : vector<2x16x128xf32>
    %7 = tpu.matmul %4, %6, %cst_10 {dimension_numbers = #tpu.dot_dimension_numbers<[2], [0], [0, 1], [1], [0, 0, 0, 1, 1, 1], [], []>} : vector<2x16x128xbf16>, vector<128x128xbf16>, vector<2x16x128xf32> -> vector<2x16x128xf32>
    %c0_11 = arith.constant 0 : index
    %c7 = arith.constant 7 : index
    %c0_12 = arith.constant 0 : index
    %8 = vector.load %arg0[%c0_11, %c7, %c0_12] : memref<2x26x128xbf16, #tpu.memory_space<vmem>>, vector<2x16x128xbf16>
    %c0_13 = arith.constant 0 : index
    %c128 = arith.constant 128 : index
    %c0_14 = arith.constant 0 : index
    %9 = vector.load %arg1[%c0_13, %c128, %c0_14] : memref<2x640x128xbf16, #tpu.memory_space<vmem>>, vector<1x128x128xbf16>
    %10 = vector.shape_cast %9 : vector<1x128x128xbf16> to vector<128x128xbf16>
    %cst_15 = arith.constant dense<0.000000e+00> : vector<2x16x128xf32>
    %11 = tpu.matmul %8, %10, %cst_15 {dimension_numbers = #tpu.dot_dimension_numbers<[2], [0], [0, 1], [1], [0, 0, 0, 1, 1, 1], [], []>} : vector<2x16x128xbf16>, vector<128x128xbf16>, vector<2x16x128xf32> -> vector<2x16x128xf32>
    %12 = arith.addf %7, %11 : vector<2x16x128xf32>
    %c0_16 = arith.constant 0 : index
    %c8 = arith.constant 8 : index
    %c0_17 = arith.constant 0 : index
    %13 = vector.load %arg0[%c0_16, %c8, %c0_17] : memref<2x26x128xbf16, #tpu.memory_space<vmem>>, vector<2x16x128xbf16>
    %c0_18 = arith.constant 0 : index
    %c256 = arith.constant 256 : index
    %c0_19 = arith.constant 0 : index
    %14 = vector.load %arg1[%c0_18, %c256, %c0_19] : memref<2x640x128xbf16, #tpu.memory_space<vmem>>, vector<1x128x128xbf16>
    %15 = vector.shape_cast %14 : vector<1x128x128xbf16> to vector<128x128xbf16>
    %cst_20 = arith.constant dense<0.000000e+00> : vector<2x16x128xf32>
    %16 = tpu.matmul %13, %15, %cst_20 {dimension_numbers = #tpu.dot_dimension_numbers<[2], [0], [0, 1], [1], [0, 0, 0, 1, 1, 1], [], []>} : vector<2x16x128xbf16>, vector<128x128xbf16>, vector<2x16x128xf32> -> vector<2x16x128xf32>
    %17 = arith.addf %12, %16 : vector<2x16x128xf32>
    %c0_21 = arith.constant 0 : index
    %c9 = arith.constant 9 : index
    %c0_22 = arith.constant 0 : index
    %18 = vector.load %arg0[%c0_21, %c9, %c0_22] : memref<2x26x128xbf16, #tpu.memory_space<vmem>>, vector<2x16x128xbf16>
    %c0_23 = arith.constant 0 : index
    %c384 = arith.constant 384 : index
    %c0_24 = arith.constant 0 : index
    %19 = vector.load %arg1[%c0_23, %c384, %c0_24] : memref<2x640x128xbf16, #tpu.memory_space<vmem>>, vector<1x128x128xbf16>
    %20 = vector.shape_cast %19 : vector<1x128x128xbf16> to vector<128x128xbf16>
    %cst_25 = arith.constant dense<0.000000e+00> : vector<2x16x128xf32>
    %21 = tpu.matmul %18, %20, %cst_25 {dimension_numbers = #tpu.dot_dimension_numbers<[2], [0], [0, 1], [1], [0, 0, 0, 1, 1, 1], [], []>} : vector<2x16x128xbf16>, vector<128x128xbf16>, vector<2x16x128xf32> -> vector<2x16x128xf32>
    %22 = arith.addf %17, %21 : vector<2x16x128xf32>
    %c0_26 = arith.constant 0 : index
    %c10 = arith.constant 10 : index
    %c0_27 = arith.constant 0 : index
    %23 = vector.load %arg0[%c0_26, %c10, %c0_27] : memref<2x26x128xbf16, #tpu.memory_space<vmem>>, vector<2x16x128xbf16>
    %c0_28 = arith.constant 0 : index
    %c512 = arith.constant 512 : index
    %c0_29 = arith.constant 0 : index
    %24 = vector.load %arg1[%c0_28, %c512, %c0_29] : memref<2x640x128xbf16, #tpu.memory_space<vmem>>, vector<1x128x128xbf16>
    %25 = vector.shape_cast %24 : vector<1x128x128xbf16> to vector<128x128xbf16>
    %cst_30 = arith.constant dense<0.000000e+00> : vector<2x16x128xf32>
    %26 = tpu.matmul %23, %25, %cst_30 {dimension_numbers = #tpu.dot_dimension_numbers<[2], [0], [0, 1], [1], [0, 0, 0, 1, 1, 1], [], []>} : vector<2x16x128xbf16>, vector<128x128xbf16>, vector<2x16x128xf32> -> vector<2x16x128xf32>
    %27 = arith.addf %22, %26 : vector<2x16x128xf32>
    %cst_31 = arith.constant dense<0.000000e+00> : vector<128xf32>
    %28 = vector.multi_reduction <add>, %27, %cst_31 [0, 1] : vector<2x16x128xf32> to vector<128xf32>
    %29 = vector.shape_cast %28 : vector<128xf32> to vector<1x1x128xf32>
    %cst_32 = arith.constant 3.125000e-02 : f32
    %30 = vector.broadcast %cst_32 : f32 to vector<1x1x128xf32>
    %31 = arith.mulf %29, %30 : vector<1x1x128xf32>
    %32 = vector.broadcast %31 : vector<1x1x128xf32> to vector<2x16x128xf32>
    %33 = arith.subf %27, %32 : vector<2x16x128xf32>
    %34 = arith.mulf %33, %33 : vector<2x16x128xf32>
    %cst_33 = arith.constant dense<0.000000e+00> : vector<128xf32>
    %35 = vector.multi_reduction <add>, %34, %cst_33 [0, 1] : vector<2x16x128xf32> to vector<128xf32>
    %36 = vector.shape_cast %35 : vector<128xf32> to vector<1x1x128xf32>
    %cst_34 = arith.constant 3.125000e-02 : f32
    %37 = vector.broadcast %cst_34 : f32 to vector<1x1x128xf32>
    %38 = arith.mulf %36, %37 : vector<1x1x128xf32>
    %c0_35 = arith.constant 0 : index
    %c0_36 = arith.constant 0 : index
    %c0_37 = arith.constant 0 : index
    %39 = vector.load %arg2[%c0_35, %c0_36, %c0_37] : memref<2x1x128xf32, #tpu.memory_space<vmem>>, vector<1x1x128xf32>
    %40 = vector.shape_cast %39 : vector<1x1x128xf32> to vector<1x128xf32>
    %41 = vector.shape_cast %40 : vector<1x128xf32> to vector<1x1x128xf32>
    %cst_38 = arith.constant 9.99999974E-6 : f32
    %42 = vector.broadcast %cst_38 : f32 to vector<1x1x128xf32>
    %43 = arith.addf %38, %42 : vector<1x1x128xf32>
    %44 = math.rsqrt %43 : vector<1x1x128xf32>
    %45 = arith.mulf %41, %44 : vector<1x1x128xf32>
    %c0_39 = arith.constant 0 : index
    %c0_40 = arith.constant 0 : index
    %c0_41 = arith.constant 0 : index
    %46 = vector.load %arg3[%c0_39, %c0_40, %c0_41] : memref<2x1x128xf32, #tpu.memory_space<vmem>>, vector<1x1x128xf32>
    %47 = vector.shape_cast %46 : vector<1x1x128xf32> to vector<1x128xf32>
    %48 = vector.shape_cast %47 : vector<1x128xf32> to vector<1x1x128xf32>
    %49 = arith.mulf %31, %45 : vector<1x1x128xf32>
    %50 = arith.subf %48, %49 : vector<1x1x128xf32>
    %51 = vector.broadcast %45 : vector<1x1x128xf32> to vector<2x16x128xf32>
    %52 = arith.mulf %27, %51 : vector<2x16x128xf32>
    %53 = vector.broadcast %50 : vector<1x1x128xf32> to vector<2x16x128xf32>
    %54 = arith.addf %52, %53 : vector<2x16x128xf32>
    %cst_42 = arith.constant 0.000000e+00 : f32
    %55 = vector.broadcast %cst_42 : f32 to vector<2x16x128xf32>
    %56 = arith.maximumf %54, %55 : vector<2x16x128xf32>
    %57 = arith.truncf %56 : vector<2x16x128xf32> to vector<2x16x128xbf16>
    %c0_43 = arith.constant 0 : index
    %c8_44 = arith.constant 8 : index
    %c0_45 = arith.constant 0 : index
    %58 = vector.load %arg5[%c0_43, %c8_44, %c0_45] : memref<2x26x128xbf16, #tpu.memory_space<vmem>>, vector<2x16x128xbf16>
    tpu.vector_store %arg5[%c0_43, %c8_44, %c0_45], %57 {strides = array<i32>} : memref<2x26x128xbf16, #tpu.memory_space<vmem>>, vector<2x16x128xbf16>,
    %c0_46 = arith.constant 0 : index
    %c6_47 = arith.constant 6 : index
    %c0_48 = arith.constant 0 : index
    %59 = vector.load %arg5[%c0_46, %c6_47, %c0_48] : memref<2x26x128xbf16, #tpu.memory_space<vmem>>, vector<2x16x128xbf16>
    %c1 = arith.constant 1 : index
    %c0_49 = arith.constant 0 : index
    %c0_50 = arith.constant 0 : index
    %60 = vector.load %arg1[%c1, %c0_49, %c0_50] : memref<2x640x128xbf16, #tpu.memory_space<vmem>>, vector<1x128x128xbf16>
    %61 = vector.shape_cast %60 : vector<1x128x128xbf16> to vector<128x128xbf16>
    %cst_51 = arith.constant dense<0.000000e+00> : vector<2x16x128xf32>
    %62 = tpu.matmul %59, %61, %cst_51 {dimension_numbers = #tpu.dot_dimension_numbers<[2], [0], [0, 1], [1], [0, 0, 0, 1, 1, 1], [], []>} : vector<2x16x128xbf16>, vector<128x128xbf16>, vector<2x16x128xf32> -> vector<2x16x128xf32>
    %c0_52 = arith.constant 0 : index
    %c7_53 = arith.constant 7 : index
    %c0_54 = arith.constant 0 : index
    %63 = vector.load %arg5[%c0_52, %c7_53, %c0_54] : memref<2x26x128xbf16, #tpu.memory_space<vmem>>, vector<2x16x128xbf16>
    %c1_55 = arith.constant 1 : index
    %c128_56 = arith.constant 128 : index
    %c0_57 = arith.constant 0 : index
    %64 = vector.load %arg1[%c1_55, %c128_56, %c0_57] : memref<2x640x128xbf16, #tpu.memory_space<vmem>>, vector<1x128x128xbf16>
    %65 = vector.shape_cast %64 : vector<1x128x128xbf16> to vector<128x128xbf16>
    %cst_58 = arith.constant dense<0.000000e+00> : vector<2x16x128xf32>
    %66 = tpu.matmul %63, %65, %cst_58 {dimension_numbers = #tpu.dot_dimension_numbers<[2], [0], [0, 1], [1], [0, 0, 0, 1, 1, 1], [], []>} : vector<2x16x128xbf16>, vector<128x128xbf16>, vector<2x16x128xf32> -> vector<2x16x128xf32>
    %67 = arith.addf %62, %66 : vector<2x16x128xf32>
    %c0_59 = arith.constant 0 : index
    %c8_60 = arith.constant 8 : index
    %c0_61 = arith.constant 0 : index
    %68 = vector.load %arg5[%c0_59, %c8_60, %c0_61] : memref<2x26x128xbf16, #tpu.memory_space<vmem>>, vector<2x16x128xbf16>
    %c1_62 = arith.constant 1 : index
    %c256_63 = arith.constant 256 : index
    %c0_64 = arith.constant 0 : index
    %69 = vector.load %arg1[%c1_62, %c256_63, %c0_64] : memref<2x640x128xbf16, #tpu.memory_space<vmem>>, vector<1x128x128xbf16>
    %70 = vector.shape_cast %69 : vector<1x128x128xbf16> to vector<128x128xbf16>
    %cst_65 = arith.constant dense<0.000000e+00> : vector<2x16x128xf32>
    %71 = tpu.matmul %68, %70, %cst_65 {dimension_numbers = #tpu.dot_dimension_numbers<[2], [0], [0, 1], [1], [0, 0, 0, 1, 1, 1], [], []>} : vector<2x16x128xbf16>, vector<128x128xbf16>, vector<2x16x128xf32> -> vector<2x16x128xf32>
    %72 = arith.addf %67, %71 : vector<2x16x128xf32>
    %c0_66 = arith.constant 0 : index
    %c9_67 = arith.constant 9 : index
    %c0_68 = arith.constant 0 : index
    %73 = vector.load %arg5[%c0_66, %c9_67, %c0_68] : memref<2x26x128xbf16, #tpu.memory_space<vmem>>, vector<2x16x128xbf16>
    %c1_69 = arith.constant 1 : index
    %c384_70 = arith.constant 384 : index
    %c0_71 = arith.constant 0 : index
    %74 = vector.load %arg1[%c1_69, %c384_70, %c0_71] : memref<2x640x128xbf16, #tpu.memory_space<vmem>>, vector<1x128x128xbf16>
    %75 = vector.shape_cast %74 : vector<1x128x128xbf16> to vector<128x128xbf16>
    %cst_72 = arith.constant dense<0.000000e+00> : vector<2x16x128xf32>
    %76 = tpu.matmul %73, %75, %cst_72 {dimension_numbers = #tpu.dot_dimension_numbers<[2], [0], [0, 1], [1], [0, 0, 0, 1, 1, 1], [], []>} : vector<2x16x128xbf16>, vector<128x128xbf16>, vector<2x16x128xf32> -> vector<2x16x128xf32>
    %77 = arith.addf %72, %76 : vector<2x16x128xf32>
    %c0_73 = arith.constant 0 : index
    %c10_74 = arith.constant 10 : index
    %c0_75 = arith.constant 0 : index
    %78 = vector.load %arg5[%c0_73, %c10_74, %c0_75] : memref<2x26x128xbf16, #tpu.memory_space<vmem>>, vector<2x16x128xbf16>
    %c1_76 = arith.constant 1 : index
    %c512_77 = arith.constant 512 : index
    %c0_78 = arith.constant 0 : index
    %79 = vector.load %arg1[%c1_76, %c512_77, %c0_78] : memref<2x640x128xbf16, #tpu.memory_space<vmem>>, vector<1x128x128xbf16>
    %80 = vector.shape_cast %79 : vector<1x128x128xbf16> to vector<128x128xbf16>
    %cst_79 = arith.constant dense<0.000000e+00> : vector<2x16x128xf32>
    %81 = tpu.matmul %78, %80, %cst_79 {dimension_numbers = #tpu.dot_dimension_numbers<[2], [0], [0, 1], [1], [0, 0, 0, 1, 1, 1], [], []>} : vector<2x16x128xbf16>, vector<128x128xbf16>, vector<2x16x128xf32> -> vector<2x16x128xf32>
    %82 = arith.addf %77, %81 : vector<2x16x128xf32>
    %cst_80 = arith.constant dense<0.000000e+00> : vector<128xf32>
    %83 = vector.multi_reduction <add>, %82, %cst_80 [0, 1] : vector<2x16x128xf32> to vector<128xf32>
    %84 = vector.shape_cast %83 : vector<128xf32> to vector<1x1x128xf32>
    %cst_81 = arith.constant 3.125000e-02 : f32
    %85 = vector.broadcast %cst_81 : f32 to vector<1x1x128xf32>
    %86 = arith.mulf %84, %85 : vector<1x1x128xf32>
    %87 = vector.broadcast %86 : vector<1x1x128xf32> to vector<2x16x128xf32>
    %88 = arith.subf %82, %87 : vector<2x16x128xf32>
    %89 = arith.mulf %88, %88 : vector<2x16x128xf32>
    %cst_82 = arith.constant dense<0.000000e+00> : vector<128xf32>
    %90 = vector.multi_reduction <add>, %89, %cst_82 [0, 1] : vector<2x16x128xf32> to vector<128xf32>
    %91 = vector.shape_cast %90 : vector<128xf32> to vector<1x1x128xf32>
    %cst_83 = arith.constant 3.125000e-02 : f32
    %92 = vector.broadcast %cst_83 : f32 to vector<1x1x128xf32>
    %93 = arith.mulf %91, %92 : vector<1x1x128xf32>
    %c1_84 = arith.constant 1 : index
    %c0_85 = arith.constant 0 : index
    %c0_86 = arith.constant 0 : index
    %94 = vector.load %arg2[%c1_84, %c0_85, %c0_86] : memref<2x1x128xf32, #tpu.memory_space<vmem>>, vector<1x1x128xf32>
    %95 = vector.shape_cast %94 : vector<1x1x128xf32> to vector<1x128xf32>
    %96 = vector.shape_cast %95 : vector<1x128xf32> to vector<1x1x128xf32>
    %cst_87 = arith.constant 9.99999974E-6 : f32
    %97 = vector.broadcast %cst_87 : f32 to vector<1x1x128xf32>
    %98 = arith.addf %93, %97 : vector<1x1x128xf32>
    %99 = math.rsqrt %98 : vector<1x1x128xf32>
    %100 = arith.mulf %96, %99 : vector<1x1x128xf32>
    %c1_88 = arith.constant 1 : index
    %c0_89 = arith.constant 0 : index
    %c0_90 = arith.constant 0 : index
    %101 = vector.load %arg3[%c1_88, %c0_89, %c0_90] : memref<2x1x128xf32, #tpu.memory_space<vmem>>, vector<1x1x128xf32>
    %102 = vector.shape_cast %101 : vector<1x1x128xf32> to vector<1x128xf32>
    %103 = vector.shape_cast %102 : vector<1x128xf32> to vector<1x1x128xf32>
    %104 = arith.mulf %86, %100 : vector<1x1x128xf32>
    %105 = arith.subf %103, %104 : vector<1x1x128xf32>
    %106 = vector.broadcast %100 : vector<1x1x128xf32> to vector<2x16x128xf32>
    %107 = arith.mulf %82, %106 : vector<2x16x128xf32>
    %108 = vector.broadcast %105 : vector<1x1x128xf32> to vector<2x16x128xf32>
    %109 = arith.addf %107, %108 : vector<2x16x128xf32>
    %cst_91 = arith.constant 0.000000e+00 : f32
    %110 = vector.broadcast %cst_91 : f32 to vector<2x16x128xf32>
    %111 = arith.maximumf %109, %110 : vector<2x16x128xf32>
    %112 = arith.truncf %111 : vector<2x16x128xf32> to vector<2x16x128xbf16>
    %c0_92 = arith.constant 0 : index
    %c0_93 = arith.constant 0 : index
    %c0_94 = arith.constant 0 : index
    %113 = vector.load %arg4[%c0_92, %c0_93, %c0_94] : memref<2x16x128xbf16, #tpu.memory_space<vmem>>, vector<2x16x128xbf16>
    tpu.vector_store %arg4[%c0_92, %c0_93, %c0_94], %112 {strides = array<i32>} : memref<2x16x128xbf16, #tpu.memory_space<vmem>>, vector<2x16x128xbf16>,
    return
  }
}

</mosaic_0001>

<bundles_post_ra>
// kernel: tpu_custom_call.1
= control target key start
LH: loop header
LB: loop body
LE: loop exit
PB: predicated region body
PF: predicated region fallthrough
CT: control target
= control target key end

     0   :  { %9 = vsyncpa [#allocation4], 0  ;;  %s2262_s0 = inlined_call_operand.vmem [shape: bf16[2,26,128], index: 0, kind: input, shape index: {}]   ;;  %s2263_s1 = inlined_call_operand.hbm [shape: bf16[2,640,128], index: 1, kind: input, shape index: {}]   ;;  %s2264_s2 = inlined_call_operand.vmem [shape: f32[2,1,128], index: 2, kind: input, shape index: {}]   ;;  %s2265_s3 = inlined_call_operand.vmem [shape: f32[2,1,128], index: 3, kind: input, shape index: {}]   ;;  %s2266_s4 = inlined_call_operand.hbm [shape: bf16[2,16,128], index: 4, kind: output, shape index: {}]  }
   0x1   :  { %10 = vsyncpa [#allocation5], 0  ;;  %s17_s17 = sshll.u32 %s2263_s1, 4  ;;  %s1969_s18 = smov [#allocation3]   ;;  %s18_s17 = int_to_ptr.hbm [resolvable:$true] %s17_s17 }
   0x2   :  { %s19_s19 = sshll.u32 %s1969_s18, 4  ;;  %s1970_s20 = smov 64   ;;  %s20_s19 = int_to_ptr.vmem [resolvable:$true] %s19_s19 }
   0x3   :  { %s1971_s21 = smov 4  }
   0x4   :  { %25 = dma.hbm_to_vmem [thread:$0]  %s18_s17, 10240, %s20_s19, [#allocation4], %s1970_s20, %s1970_s20, %s1971_s21  }
   0x5   :  { %1965 = dma.done.wait [#allocation4], 10240  }
   0x6   :  { %1966 = vsyncadd [#allocation4], 4294957056  ;;  %v1814_v0 = vld [vmem:[#allocation3 + $0x78] sm:$0xff]  ;;  %v1813_v4 = vld [vmem:[#allocation3 + $0x70] sm:$0xff]  ;;  %vm79_vm0 = vsmask.f32 256 }
   0x7   :  { %v1804_v1 = vld [vmem:[#allocation3 + $0x38] sm:$0xff]  ;;  %182 = vmatpush.bf16.msra.mxu0 %v1814_v0  ;;  %v1803_v5 = vld [vmem:[#allocation3 + $0x30] sm:$0xff]  ;;  %v1812_v8 = vld [vmem:[#allocation3 + $0x68] sm:$0xff]  ;;  %vm80_vm1 = vsmask.f32 4368  ;;  %vm207_vm2 = vcmask 1040384  }
   0x8   :  { %v1822_v2 = vld [vmem:[#allocation3 + $0xb8] sm:$0xff]  ;;  %280 = vmatpush.bf16.msra.mxu1 %v1804_v1  ;;  %v1821_v6 = vld [vmem:[#allocation3 + $0xb0] sm:$0xff]  ;;  %v1802_v9 = vld [vmem:[#allocation3 + $0x28] sm:$0xff]  ;;  %vm208_vm3 = vcmask 1044484   ;;  %vm418_vm4 = vsmask.f32 3328 }
   0x9   :  { %v1830_v3 = vld [vmem:[#allocation3 + $0xf8] sm:$0xff]  ;;  %373 = vmatpush.bf16.msra.mxu2 %v1822_v2  ;;  %v1829_v7 = vld [vmem:[#allocation3 + $0xf0] sm:$0xff]  ;;  %v1820_v10 = vld [vmem:[#allocation3 + $0xa8] sm:$0xff]  ;;  %vm419_vm5 = vsmask.f32 7440  ;;  %vm572_vm9 = vcmask 1042432  }
   0xa   :  { %525 = vmatpush.bf16.msra.mxu3 %v1830_v3  ;;  %v1828_v11 = vld [vmem:[#allocation3 + $0xe8] sm:$0xff]  ;;  %v1811_v12 = vld [vmem:[#allocation3 + $0x60] sm:$0xff]  ;;  %v1810_v23 = vld [vmem:[#allocation3 + $0x58] sm:$0xff]  ;;  %vm573_vm10 = vcmask 1046532   ;;  %s1434_s15 = sshll.u32 %s2266_s4, 4  ;;  %s1435_s15 = int_to_ptr.hbm [resolvable:$true] %s1434_s15 }
   0xb   :  { %183 = vmatpush.bf16.msra.mxu0 %v1813_v4  ;;  %v1801_v13 = vld [vmem:[#allocation3 + $0x20] sm:$0xff]  ;;  %v61_v18 = vld [vmem:[%s2262_s0 + $0x8] sm:$0xf]  ;;  %v1800_v24 = vld [vmem:[#allocation3 + $0x18] sm:$0xff] }
   0xc   :  { %281 = vmatpush.bf16.msra.mxu1 %v1803_v5  ;;  %v1819_v14 = vld [vmem:[#allocation3 + $0xa0] sm:$0xff]  ;;  %v97_v22 = vshrl.u32 %v61_v18, 16  ;;  %v100_v25 = vshll.u32 %v61_v18, 16  ;;  %v41_v26 = vld [vmem:[%s2262_s0 + $0x8] sm:$0x7]  ;;  %v1818_v32 = vld [vmem:[#allocation3 + $0x98] sm:$0xff] }
   0xd   :  { %374 = vmatpush.bf16.msra.mxu2 %v1821_v6  ;;  %v39_v15 = vld [vmem:[%s2262_s0] sm:$0x8]  ;;  %v40_v17 = vld [vmem:[%s2262_s0 + $0x4] sm:$0xf]  ;;  %v2023_v31 = vld [vmem:[%s2262_s0 + $0x8] sm:$0xf] }
   0xe   :  { %526 = vmatpush.bf16.msra.mxu3 %v1829_v7  ;;  %v1827_v16 = vld [vmem:[#allocation3 + $0xe0] sm:$0xff]  ;;  %v83_v19 = vshrl.u32 %v39_v15, 16  ;;  %v88_v20 = vshrl.u32 %v40_v17, 16  ;;  %v91_v21 = vshll.u32 %v40_v17, 16  ;;  %v212_v27 = vrot.slane %v40_v17, 7  ;;  %v1826_v33 = vld [vmem:[#allocation3 + $0xd8] sm:$0xff]  ;;  %vm2027_vm6 = vmor %vm207_vm2, %vm208_vm3 }
   0xf   :  { %184 = vmatpush.bf16.msra.mxu0 %v1812_v8  ;;  %v99_v29 = vrot.slane %v97_v22, 7  ;;  %v396_v30 = vld [vmem:[%s2262_s0 + $0x4] sm:$0xf]  ;;  %v1481_v35 = vrot.slane %v39_v15, 11  ;;  %v215_v41 = vrot.slane %v41_v26, 7  ;;  %v431_v47 = vshll.u32 %v2023_v31, 16  ;;  %vm2039_vm7 = vmor %vm79_vm0, %vm80_vm1 }
  0x10   :  { %282 = vmatpush.bf16.msra.mxu1 %v1802_v9  ;;  %v90_v28 = vrot.slane %v88_v20, 7  ;;  %v1447_v34 = vrot.slane %v83_v19, 11  ;;  %v422_v36 = vshrl.u32 %v396_v30, 16  ;;  %v425_v37 = vshll.u32 %v396_v30, 16  ;;  %v2034_v44 = vld [vmem:[%s2262_s0 + $0xc] sm:$0x1]  ;;  %vm2050_vm8 = vmor %vm418_vm4, %vm419_vm5 }
  0x11   :  { %375 = vmatpush.bf16.msra.mxu2 %v1820_v10  ;;  %v214_v40 = vrot.slane %v212_v27, 4  ;;  %v102_v42 = vor.u32 %v100_v25, %v99_v29  ;;  %v1809_v48 = vld [vmem:[#allocation3 + $0x50] sm:$0xff]  ;;  %v435_v51 = vshrl.u32 %v2023_v31, 16  ;;  %v433_v55 = vrot.slane %v431_v47, 5  ;;  %v1808_v61 = vld [vmem:[#allocation3 + $0x48] sm:$0xff]  ;;  %v1807_v19 = vld [vmem:[#allocation3 + $0x40] sm:$0xff] }
  0x12   :  { %527 = vmatpush.bf16.msra.mxu3 %v1828_v11  ;;  %v93_v38 = vor.u32 %v91_v21, %v90_v28  ;;  %v95_v39 = vrot.slane %v90_v28, 4  ;;  %v424_v45 = vrot.slane %v422_v36, 4  ;;  %v427_v46 = vrot.slane %v425_v37, 5  ;;  %v1799_v49 = vld [vmem:[#allocation3 + $0x10] sm:$0xff]  ;;  %v1798_v2 = vld [vmem:[#allocation3 + $0x8] sm:$0xff]  ;;  %v1797_v20 = vld [vmem:[#allocation3] sm:$0xff] }
  0x13   :  { %185 = vmatpush.bf16.msra.mxu0 %v1811_v12  ;;  %v1817_v52 = vld [vmem:[#allocation3 + $0x90] sm:$0xff]  ;;  %v213_v56 = vsel %vm2027_vm6, %v1481_v35, %v212_v27  ;;  %v216_v57 = vsel %vm2027_vm6, %v214_v40, %v215_v41  ;;  %v437_v59 = vrot.slane %v435_v51, 4  ;;  %v441_v60 = vshll.u32 %v2034_v44, 16  ;;  %v2067_v5 = vld [vmem:[%s2262_s0 + $0x18] sm:$0xf]  ;;  %v1816_v7 = vld [vmem:[#allocation3 + $0x88] sm:$0xff] }
  0x14   :  { %283 = vmatpush.bf16.msra.mxu1 %v1801_v13  ;;  %v1825_v53 = vld [vmem:[#allocation3 + $0xd0] sm:$0xff]  ;;  %v428_v54 = vor.u32 %v427_v46, %v424_v45  ;;  %v94_v62 = vsel %vm2039_vm7, %v1447_v34, %v93_v38  ;;  %v103_v63 = vsel %vm2039_vm7, %v95_v39, %v102_v42  ;;  %v1824_v8 = vld [vmem:[#allocation3 + $0xc8] sm:$0xff]  ;;  %v224_v9 = vunpack.c.l.b16 %v213_v56  ;;  %v1823_v25 = vld [vmem:[#allocation3 + $0xc0] sm:$0xff] }
  0x15   :  { %376 = vmatpush.bf16.msra.mxu2 %v1819_v14  ;;  %v2062_v1 = vld [vmem:[%s2262_s0 + $0x14] sm:$0xf]  ;;  %v438_v3 = vor.u32 %v437_v59, %v433_v55  ;;  %v443_v4 = vrot.slane %v441_v60, 5  ;;  %v225_v10 = vunpack.c.l.b16 %v216_v57  ;;  %v126_v12 = vunpack.c.l.b16 %v94_v62  ;;  %v2077_v15 = vld [vmem:[%s2262_s0 + $0x10] sm:$0x8]  ;;  %v1838_v30 = vld [vmem:[#allocation3 + $0x138] sm:$0xff] }
  0x16   :  { %528 = vmatpush.bf16.msra.mxu3 %v1827_v16  ;;  %v429_v0 = vrot.slane %v428_v54, 4  ;;  %v399_v6 = vld [vmem:[%s2262_s0 + $0x14] sm:$0xf]  ;;  %v127_v13 = vunpack.c.l.b16 %v103_v63  ;;  %v110_v16 = vshrl.u32 %v2062_v1, 16  ;;  %v119_v17 = vshrl.u32 %v2067_v5, 16  ;;  %v1805_v40 = vld [vmem:[%s2262_s0 + $0x4] sm:$0xff]  ;;  %vm2127_vm11 = vmor %vm572_vm9, %vm573_vm10 }
  0x17   :  { %186 = vmatpush.bf16.msra.mxu0 %v1810_v23  ;;  %v439_v14 = vrot.slane %v438_v3, 4  ;;  %v446_v18 = vshrl.u32 %v399_v6, 16  ;;  %v2086_v23 = vld [vmem:[%s2262_s0 + $0x18] sm:$0xf]  ;;  %v228_v26 = vpack.c.b16 %v225_v10, %v224_v9  ;;  %v105_v28 = vshrl.u32 %v2077_v15, 16  ;;  %v1837_v51 = vld [vmem:[#allocation3 + $0x130] sm:$0xff] }
  0x18   :  { %284 = vmatpush.bf16.msra.mxu1 %v1800_v24  ;;  %v434_v11 = vsel %vm2050_vm8, %v429_v0, %v433_v55  ;;  %v1815_v24 = vld [vmem:[#allocation3 + $0x80] sm:$0xff]  ;;  %v130_v29 = vpack.c.b16 %v127_v13, %v126_v12  ;;  %v449_v35 = vshll.u32 %v399_v6, 16  ;;  %v112_v36 = vrot.slane %v110_v16, 7  ;;  %v44_v47 = vld [vmem:[%s2262_s0 + $0x18] sm:$0x7] }
  0x19   :  { %377 = vmatpush.bf16.msra.mxu2 %v1818_v32  ;;  %v444_v21 = vsel %vm2050_vm8, %v439_v14, %v443_v4  ;;  %v469_v22 = vunpack.c.l.b16 %v434_v11  ;;  %v113_v32 = vshll.u32 %v2062_v1, 16  ;;  %v448_v34 = vrot.slane %v446_v18, 4  ;;  %v1835_v9 = vld [vmem:[#allocation3 + $0x120] sm:$0xff]  ;;  %v1834_v16 = vld [vmem:[#allocation3 + $0x118] sm:$0xff] }
  0x1a   :  { %529 = vmatpush.bf16.msra.mxu3 %v1826_v33  ;;  %v470_v27 = vunpack.c.l.b16 %v444_v21  ;;  %v2093_v33 = vld [vmem:[%s2262_s0 + $0x1c] sm:$0x1]  ;;  %v121_v37 = vrot.slane %v119_v17, 7  ;;  %v122_v38 = vshll.u32 %v2067_v5, 16  ;;  %v455_v39 = vshll.u32 %v2086_v23, 16 }
  0x1b   :  { %187 = vmatpush.bf16.msra.mxu0 %v1809_v48  ;;  %v219_v42 = vrot.slane %v2062_v1, 7  ;;  %v451_v45 = vrot.slane %v449_v35, 5  ;;  %v459_v46 = vshrl.u32 %v2086_v23, 16  ;;  %v1448_v54 = vrot.slane %v105_v28, 11  ;;  %v1836_v1 = vld [vmem:[#allocation3 + $0x128] sm:$0xff] }
  0x1c   :  { %285 = vmatpush.bf16.msra.mxu1 %v1799_v49  ;;  %v473_v41 = vpack.c.b16 %v470_v27, %v469_v22  ;;  %v457_v48 = vrot.slane %v455_v39, 5  ;;  %v465_v49 = vshll.u32 %v2093_v33, 16  ;;  %v115_v55 = vor.u32 %v113_v32, %v112_v36  ;;  %v548_v22 = vld [vmem:[%s2262_s0 + $0x4] sm:$0xe] }
  0x1d   :  { %378 = vmatpush.bf16.msra.mxu2 %v1817_v52  ;;  %v452_v52 = vor.u32 %v451_v45, %v448_v34  ;;  %v117_v56 = vrot.slane %v112_v36, 4  ;;  %v1482_v57 = vrot.slane %v2077_v15, 11  ;;  %v124_v59 = vor.u32 %v122_v38, %v121_v37  ;;  %v1831_v32 = vld [vmem:[#allocation3 + $0x100] sm:$0xff]  ;;  %v549_v37 = vld [vmem:[%s2262_s0 + $0x14] sm:$0xe] }
  0x1e   :  { %530 = vmatpush.bf16.msra.mxu3 %v1825_v53  ;;  %v461_v53 = vrot.slane %v459_v46, 4  ;;  %v221_v60 = vrot.slane %v219_v42, 4  ;;  %v467_v0 = vrot.slane %v465_v49, 5  ;;  %v116_v3 = vsel %vm2039_vm7, %v1448_v54, %v115_v55 }
  0x1f   :  { %188 = vmatpush.bf16.msra.mxu0 %v1808_v61  ;;  %v222_v61 = vrot.slane %v44_v47, 7  ;;  %v453_v63 = vrot.slane %v452_v52, 4  ;;  %v125_v4 = vsel %vm2039_vm7, %v117_v56, %v124_v59  ;;  %v220_v5 = vsel %vm2027_vm6, %v1482_v57, %v219_v42 }
  0x20   :  { %286 = vmatpush.bf16.msra.mxu1 %v1798_v2  ;;  %v462_v62 = vor.u32 %v461_v53, %v457_v48  ;;  %v128_v10 = vunpack.c.l.b16 %v116_v3  ;;  %v129_v11 = vunpack.c.l.b16 %v125_v4  ;;  %v226_v12 = vunpack.c.l.b16 %v220_v5 }
  0x21   :  { %379 = vmatpush.bf16.msra.mxu2 %v1816_v7  ;;  %v223_v6 = vsel %vm2027_vm6, %v221_v60, %v222_v61  ;;  %v458_v7 = vsel %vm2050_vm8, %v453_v63, %v457_v48  ;;  %v577_v21 = vrot.slane %v2023_v31, 5  ;;  %v580_v27 = vrot.slane %v2034_v44, 5  ;;  %v1832_v31 = vld [vmem:[#allocation3 + $0x108] sm:$0xff] }
  0x22   :  { %531 = vmatpush.bf16.msra.mxu3 %v1824_v8  ;;  %v463_v2 = vrot.slane %v462_v62, 4  ;;  %v227_v13 = vunpack.c.l.b16 %v223_v6  ;;  %v471_v14 = vunpack.c.l.b16 %v458_v7  ;;  %v131_v17 = vpack.c.b16 %v129_v11, %v128_v10 }
  0x23   :  { %189 = vmatpush.bf16.msra.mxu0 %v1807_v19  ;;  %v1806_v19 = vld [vmem:[%s2262_s0 + $0x14] sm:$0xff]  ;;  %v584_v44 = vrot.slane %v2086_v23, 5  ;;  %v1588_v38 = vrot.slane %v549_v37, 9 }
  0x24   :  { %287 = vmatpush.bf16.msra.mxu1 %v1797_v20  ;;  %v468_v8 = vsel %vm2050_vm8, %v463_v2, %v467_v0  ;;  %v229_v18 = vpack.c.b16 %v227_v13, %v226_v12 }
  0x25   :  { %380 = vmatpush.bf16.msra.mxu2 %v1815_v24  ;;  %v472_v15 = vunpack.c.l.b16 %v468_v8  ;;  %v1833_v24 = vld [vmem:[#allocation3 + $0x110] sm:$0xff]  ;;  %v586_v39 = vrot.slane %v584_v44, 4 }
  0x26   :  { %532 = vmatpush.bf16.msra.mxu3 %v1823_v25  ;;  %190 = vmatmul.bf16.vlgmr.msra.gmra.mxu0 %v130_v29  ;;  %v1587_v25 = vrot.slane %v548_v22, 9 }
  0x27   :  { %645 = vmatpush.bf16.msrb.mxu0 %v1838_v30  ;;  %288 = vmatmul.bf16.vlgmr.msra.gmra.mxu1 %v228_v26  ;;  %v474_v20 = vpack.c.b16 %v472_v15, %v471_v14  ;;  %v579_v26 = vrot.slane %v577_v21, 4 }
  0x28   :  { %381 = vmatmul.bf16.vlgmr.msra.gmra.mxu2 %v1805_v40  ;;  %v578_v29 = vsel %vm2127_vm11, %v1587_v25, %v577_v21  ;;  %v587_v40 = vrot.slane %v2093_v33, 5 }
  0x29   :  { %533 = vmatmul.bf16.vlgmr.msra.gmra.mxu3 %v473_v41  ;;  %v581_v30 = vsel %vm2127_vm11, %v579_v26, %v580_v27  ;;  %v589_v34 = vunpack.c.l.b16 %v578_v29  ;;  %v585_v41 = vsel %vm2127_vm11, %v1588_v38, %v584_v44 }
  0x2a   :  { %v590_v35 = vunpack.c.l.b16 %v581_v30  ;;  %v588_v42 = vsel %vm2127_vm11, %v586_v39, %v587_v40  ;;  %v591_v45 = vunpack.c.l.b16 %v585_v41  ;;  %v1864_v40 = vld [vmem:[#allocation3 + $0x1f8] sm:$0xff] }
  0x2b   :  { %646 = vmatpush.bf16.msrb.mxu0 %v1837_v51  ;;  %v592_v46 = vunpack.c.l.b16 %v588_v42  ;;  %1067 = vmatpush.bf16.msrb.mxu3 %v1864_v40  ;;  %v709_v40 = vld [vmem:[%s2265_s3] sm:$0x1] }
  0x2c   :  { %v593_v36 = vpack.c.b16 %v590_v35, %v589_v34 }
  0x2d   :  { %v594_v47 = vpack.c.b16 %v592_v46, %v591_v45  ;;  %v1863_v46 = vld [vmem:[#allocation3 + $0x1f0] sm:$0xff] }
  0x2f   :  { %647 = vmatpush.bf16.msrb.mxu0 %v1836_v1  ;;  %1068 = vmatpush.bf16.msrb.mxu3 %v1863_v46 }
  0x33   :  { %648 = vmatpush.bf16.msrb.mxu0 %v1835_v9 }
  0x36   :  { %195 = vmatmul.bf16.gmra.mxu0 %v131_v17 }
  0x37   :  { %649 = vmatpush.bf16.msrb.mxu0 %v1834_v16  ;;  %293 = vmatmul.bf16.gmra.mxu1 %v229_v18 }
  0x38   :  { %386 = vmatmul.bf16.gmra.mxu2 %v1806_v19 }
  0x39   :  { %538 = vmatmul.bf16.gmra.mxu3 %v474_v20 }
  0x3b   :  { %650 = vmatpush.bf16.msrb.mxu0 %v1833_v24 }
  0x3f   :  { %651 = vmatpush.bf16.msrb.mxu0 %v1832_v31 }
  0x43   :  { %652 = vmatpush.bf16.msrb.mxu0 %v1831_v32 }
  0x46   :  { %653 = vmatmul.bf16.vlgmr.msrb.gmra.mxu0 %v593_v36 }
  0x56   :  { %658 = vmatmul.bf16.gmra.mxu0 %v594_v47 }
  0xa3   :  { %v191_v23 = vpop.f32.mrf.mxu0 }
  0xa4   :  { %v289_v49 = vpop.f32.mrf.mxu1 }
  0xa5   :  { %v290_v0 = vadd.f32 %v289_v49, %v191_v23  ;;  %v1862_v49 = vld [vmem:[#allocation3 + $0x1e8] sm:$0xff] }
  0xa6   :  { %1069 = vmatpush.bf16.msrb.mxu3 %v1862_v49 }
  0xab   :  { %v193_v48 = vpop.f32.mrf.mxu0  ;;  %v382_v52 = vpop.f32.mrf.mxu2 }
  0xac   :  { %v534_v53 = vpop.f32.mrf.mxu3  ;;  %v291_v55 = vpop.f32.mrf.mxu1  ;;  %v392_v4 = vadd.f32 %v382_v52, %v290_v0  ;;  %v1856_v52 = vld [vmem:[#allocation3 + $0x1b8] sm:$0xff]  ;;  %v1854_v0 = vld [vmem:[#allocation3 + $0x1a8] sm:$0xff] }
  0xad   :  { %v292_v63 = vadd.f32 %v291_v55, %v193_v48  ;;  %v1846_v48 = vld [vmem:[#allocation3 + $0x178] sm:$0xff]  ;;  %879 = vmatpush.bf16.msrb.mxu1 %v1856_v52  ;;  %v1877_v52 = vld [vmem:[#allocation3 + $0x260] sm:$0xff] }
  0xae   :  { %v544_v10 = vadd.f32 %v534_v53, %v392_v4  ;;  %974 = vmatpush.bf16.msrb.mxu2 %v1846_v48  ;;  %v2166_v55 = vld [vmem:[#allocation3 + $0x238] sm:$0xff]  ;;  %v1859_v4 = vld [vmem:[#allocation3 + $0x1d0] sm:$0xff] }
  0xaf   :  { %1216 = vmatpush.bf16.msra.mxu0 %v2166_v55 }
  0xb3   :  { %v196_v51 = vpop.f32.mrf.mxu0  ;;  %v384_v56 = vpop.f32.mrf.mxu2 }
  0xb4   :  { %v536_v33 = vpop.f32.mrf.mxu3  ;;  %v294_v59 = vpop.f32.mrf.mxu1  ;;  %v393_v1 = vadd.f32 %v384_v56, %v292_v63  ;;  %v1861_v56 = vld [vmem:[#allocation3 + $0x1e0] sm:$0xff] }
  0xb5   :  { %v295_v2 = vadd.f32 %v294_v59, %v196_v51  ;;  %1070 = vmatpush.bf16.msrb.mxu3 %v1861_v56  ;;  %v1876_v56 = vld [vmem:[#allocation3 + $0x258] sm:$0xff] }
  0xb6   :  { %v545_v8 = vadd.f32 %v536_v33, %v393_v1 }
  0xbb   :  { %v198_v54 = vpop.f32.mrf.mxu0  ;;  %v387_v60 = vpop.f32.mrf.mxu2 }
  0xbc   :  { %v539_v62 = vpop.f32.mrf.mxu3  ;;  %v296_v3 = vpop.f32.mrf.mxu1  ;;  %v394_v5 = vadd.f32 %v387_v60, %v295_v2  ;;  %v1844_v60 = vld [vmem:[#allocation3 + $0x168] sm:$0xff]  ;;  %v1843_v2 = vld [vmem:[#allocation3 + $0x160] sm:$0xff] }
  0xbd   :  { %v297_v9 = vadd.f32 %v296_v3, %v198_v54  ;;  %v1845_v54 = vld [vmem:[#allocation3 + $0x170] sm:$0xff]  ;;  %v2172_v3 = vld [vmem:[#allocation3 + $0x228] sm:$0xff] }
  0xbe   :  { %v546_v11 = vadd.f32 %v539_v62, %v394_v5  ;;  %975 = vmatpush.bf16.msrb.mxu2 %v1845_v54  ;;  %v1860_v62 = vld [vmem:[#allocation3 + $0x1d8] sm:$0xff]  ;;  %v1853_v5 = vld [vmem:[#allocation3 + $0x1a0] sm:$0xff] }
  0xbf   :  { %1071 = vmatpush.bf16.msrb.mxu3 %v1860_v62 }
  0xc2   :  { %976 = vmatpush.bf16.msrb.mxu2 %v1844_v60 }
  0xc3   :  { %v654_v57 = vpop.f32.mrf.mxu0  ;;  %v389_v6 = vpop.f32.mrf.mxu2  ;;  %1072 = vmatpush.bf16.msrb.mxu3 %v1859_v4 }
  0xc4   :  { %v395_v12 = vadd.f32 %v389_v6, %v297_v9  ;;  %v541_v14 = vpop.f32.mrf.mxu3  ;;  %v2146_v15 = vadd.f32 %v654_v57, %v544_v10  ;;  %v1855_v57 = vld [vmem:[#allocation3 + $0x1b0] sm:$0xff]  ;;  %v1842_v6 = vld [vmem:[#allocation3 + $0x158] sm:$0xff]  ;;  %v1972_v9 = vmov 0  }
  0xc5   :  { %880 = vmatpush.bf16.msrb.mxu1 %v1855_v57  ;;  %35 = vst [vmem:[#allocation2] sm:$0xf] %v1972_v9  ;;  %v1852_v10 = vld [vmem:[#allocation3 + $0x198] sm:$0xff] }
  0xc6   :  { %v547_v17 = vadd.f32 %v541_v14, %v395_v12  ;;  %977 = vmatpush.bf16.msrb.mxu2 %v1843_v2  ;;  %36 = vst [vmem:[#allocation2 + $0x10] sm:$0xf] %v1972_v9  ;;  %v2178_v12 = vld [vmem:[#allocation3 + $0x218] sm:$0xff] }
  0xc7   :  { %37 = vst [vmem:[#allocation2 + $0xc] sm:$0x1] %v1972_v9 }
  0xc8   :  { %38 = vst [vmem:[#allocation2 + $0x1c] sm:$0x1] %v1972_v9 }
  0xc9   :  { %881 = vmatpush.bf16.msrb.mxu1 %v1854_v0  ;;  %v1874_v0 = vld [vmem:[#allocation3 + $0x248] sm:$0xff] }
  0xca   :  { %978 = vmatpush.bf16.msrb.mxu2 %v1842_v6 }
  0xcb   :  { %v656_v61 = vpop.f32.mrf.mxu0 }
  0xcc   :  { %v2144_v13 = vadd.f32 %v656_v61, %v545_v8  ;;  %v2169_v61 = vld [vmem:[#allocation3 + $0x230] sm:$0xff]  ;;  %v1858_v8 = vld [vmem:[#allocation3 + $0x1c8] sm:$0xff]  ;;  %v738_v62 = vld [vmem:[#allocation2] sm:$0x8] }
  0xcd   :  { %1217 = vmatpush.bf16.msra.mxu0 %v2169_v61  ;;  %882 = vmatpush.bf16.msrb.mxu1 %v1853_v5 }
  0xce   :  { %v668_v18 = vadd.f32 %v2144_v13, %v2146_v15  ;;  %1073 = vmatpush.bf16.msrb.mxu3 %v1858_v8 }
  0xd1   :  { %1218 = vmatpush.bf16.msra.mxu0 %v2172_v3  ;;  %883 = vmatpush.bf16.msrb.mxu1 %v1852_v10 }
  0xd3   :  { %v659_v7 = vpop.f32.mrf.mxu0 }
  0xd4   :  { %v2148_v16 = vadd.f32 %v659_v7, %v546_v11  ;;  %v2175_v7 = vld [vmem:[#allocation3 + $0x220] sm:$0xff]  ;;  %v1841_v11 = vld [vmem:[#allocation3 + $0x150] sm:$0xff] }
  0xd5   :  { %1219 = vmatpush.bf16.msra.mxu0 %v2175_v7  ;;  %979 = vmatpush.bf16.msrb.mxu2 %v1841_v11 }
  0xd6   :  { %v669_v20 = vadd.f32 %v668_v18, %v2148_v16 }
  0xd9   :  { %1220 = vmatpush.bf16.msra.mxu0 %v2178_v12 }
  0xdb   :  { %v661_v19 = vpop.f32.mrf.mxu0 }
  0xdc   :  { %v2153_v21 = vadd.f32 %v661_v19, %v547_v17  ;;  %v1857_v17 = vld [vmem:[#allocation3 + $0x1c0] sm:$0xff]  ;;  %v1851_v19 = vld [vmem:[#allocation3 + $0x190] sm:$0xff] }
  0xdd   :  { %1074 = vmatpush.bf16.msrb.mxu3 %v1857_v17  ;;  %884 = vmatpush.bf16.msrb.mxu1 %v1851_v19 }
  0xde   :  { %v670_v22 = vadd.f32 %v669_v20, %v2153_v21 }
  0xe0   :  { %v671_v24 = vrot.slane %v670_v22, 4 }
  0xe2   :  { %v672_v25 = vadd.f32 %v671_v24, %v670_v22  ;;  %v1840_v22 = vld [vmem:[#allocation3 + $0x148] sm:$0xff]  ;;  %v2181_v24 = vld [vmem:[#allocation3 + $0x210] sm:$0xff] }
  0xe3   :  { %980 = vmatpush.bf16.msrb.mxu2 %v1840_v22  ;;  %1221 = vmatpush.bf16.msra.mxu0 %v2181_v24 }
  0xe4   :  { %v673_v26 = vrot.slane %v672_v25, 2 }
  0xe6   :  { %v674_v27 = vadd.f32 %v673_v26, %v672_v25  ;;  %v1880_v25 = vld [vmem:[#allocation3 + $0x278] sm:$0xff] }
  0xe7   :  { %1900 = vmatpush.bf16.msra.mxu3 %v1880_v25 }
  0xe8   :  { %v675_v31 = vrot.slane %v674_v27, 1 }
  0xea   :  { %v676_v29 = vadd.f32 %v675_v31, %v674_v27  ;;  %v1850_v27 = vld [vmem:[#allocation3 + $0x188] sm:$0xff]  ;;  %v1879_v31 = vld [vmem:[#allocation3 + $0x270] sm:$0xff] }
  0xeb   :  { %885 = vmatpush.bf16.msrb.mxu1 %v1850_v27  ;;  %1901 = vmatpush.bf16.msra.mxu3 %v1879_v31 }
  0xec   :  { %v2156_v30 = vmul.f32 0.03125, %v676_v29 }
  0xee   :  { %v678_v32 = vsub.f32 %v2146_v15, %v2156_v30  ;;  %v679_v34 = vsub.f32 %v2144_v13, %v2156_v30  ;;  %v680_v35 = vsub.f32 %v2148_v16, %v2156_v30  ;;  %v681_v36 = vsub.f32 %v2153_v21, %v2156_v30 }
  0xf0   :  { %v682_v44 = vmul.f32 %v678_v32, %v678_v32  ;;  %v683_v37 = vmul.f32 %v679_v34, %v679_v34  ;;  %v684_v38 = vmul.f32 %v680_v35, %v680_v35  ;;  %v685_v41 = vmul.f32 %v681_v36, %v681_v36  ;;  %v1839_v32 = vld [vmem:[#allocation3 + $0x140] sm:$0xff]  ;;  %v2184_v34 = vld [vmem:[#allocation3 + $0x208] sm:$0xff] }
  0xf1   :  { %v696_v35 = vld [vmem:[%s2264_s2] sm:$0x1]  ;;  %981 = vmatpush.bf16.msrb.mxu2 %v1839_v32  ;;  %1222 = vmatpush.bf16.msra.mxu0 %v2184_v34 }
  0xf2   :  { %v686_v39 = vadd.f32 %v683_v37, %v682_v44  ;;  %v1849_v44 = vld [vmem:[#allocation3 + $0x180] sm:$0xff] }
  0xf3   :  { %886 = vmatpush.bf16.msrb.mxu1 %v1849_v44 }
  0xf4   :  { %v687_v42 = vadd.f32 %v686_v39, %v684_v38  ;;  %v2190_v38 = vld [vmem:[#allocation3 + $0x200] sm:$0xff] }
  0xf5   :  { %1892 = vmatpush.bf16.msra.mxu2 %v2166_v55  ;;  %1223 = vmatpush.bf16.msra.mxu0 %v2190_v38 }
  0xf6   :  { %v688_v45 = vadd.f32 %v687_v42, %v685_v41  ;;  %v1878_v41 = vld [vmem:[#allocation3 + $0x268] sm:$0xff] }
  0xf7   :  { %1333 = vmatpush.bf16.msra.mxu1 %v1880_v25  ;;  %1902 = vmatpush.bf16.msra.mxu3 %v1878_v41 }
  0xf8   :  { %v689_v47 = vrot.slane %v688_v45, 4 }
  0xf9   :  { %1893 = vmatpush.bf16.msra.mxu2 %v2169_v61 }
  0xfa   :  { %v690_v23 = vadd.f32 %v689_v47, %v688_v45 }
  0xfb   :  { %1334 = vmatpush.bf16.msra.mxu1 %v1879_v31  ;;  %1903 = vmatpush.bf16.msra.mxu3 %v1877_v52 }
  0xfc   :  { %v691_v51 = vrot.slane %v690_v23, 2 }
  0xfd   :  { %1894 = vmatpush.bf16.msra.mxu2 %v2172_v3  ;;  %v2206_v3 = vld [vmem:[#allocation2 + $0xc] sm:$0x1] }
  0xfe   :  { %v692_v53 = vadd.f32 %v691_v51, %v690_v23  ;;  %v1132_v6 = vshll.u32 %v2206_v3, 16 }
  0xff   :  { %1335 = vmatpush.bf16.msra.mxu1 %v1878_v41  ;;  %1904 = vmatpush.bf16.msra.mxu3 %v1876_v56 }
 0x100   :  { %v693_v33 = vrot.slane %v692_v53, 1 }
 0x101   :  { %1895 = vmatpush.bf16.msra.mxu2 %v2175_v7  ;;  %v1873_v7 = vld [vmem:[#allocation3 + $0x240] sm:$0xff] }
 0x102   :  { %v694_v59 = vadd.f32 %v693_v33, %v692_v53 }
 0x103   :  { %1336 = vmatpush.bf16.msra.mxu1 %v1877_v52 }
 0x104   :  { %v695_v63 = vmul.f32 0.03125, %v694_v59 }
 0x105   :  { %1896 = vmatpush.bf16.msra.mxu2 %v2178_v12 }
 0x106   :  { %v697_v1 = vadd.f32 1e-05, %v695_v63  ;;  %v780_v63 = vshrl.u32 %v738_v62, 16 }
 0x107   :  { %1337 = vmatpush.bf16.msra.mxu1 %v1876_v56  ;;  %v741_v56 = vld [vmem:[#allocation2 + $0x10] sm:$0x8] }
 0x108   :  { %1913 = vrsqrt.f32 %v697_v1  ;;  %vm704_vm13 = vweird.f32 %v697_v1  ;;  %v1621_v2 = vrot.slane %v780_v63, 11 }
 0x109   :  { %1897 = vmatpush.bf16.msra.mxu2 %v2181_v24 }
 0x10d   :  { %1898 = vmatpush.bf16.msra.mxu2 %v2184_v34 }
 0x10e   :  { %v1914_v14 = vpop.eup %1913 }
 0x10f   :  { %v699_v18 = vmul.f32 %v1914_v14, %v697_v1  ;;  %vm705_vm12 = vweird.f32 %v1914_v14  ;;  %v1655_v1 = vrot.slane %v738_v62, 11 }
 0x110   :  { %vm706_vm14 = vmor %vm704_vm13, %vm705_vm12 }
 0x111   :  { %v700_v20 = vmul.f32 %v1914_v14, %v699_v18  ;;  %1899 = vmatpush.bf16.msra.mxu2 %v2190_v38 }
 0x113   :  { %v701_v26 = vmul.f32 0.5, %v700_v20 }
 0x115   :  { %v702_v29 = vsub.f32 1.5, %v701_v26 }
 0x117   :  { %v703_v36 = vmul.f32 %v1914_v14, %v702_v29 }
 0x119   :  { %v707_v37 = vsel %vm706_vm14, %v1914_v14, %v703_v36 }
 0x11a   :  { %v708_v39 = vmul.f32 %v707_v37, %v696_v35 }
 0x11c   :  { %v710_v42 = vmul.f32 %v708_v39, %v2156_v30  ;;  %v713_v45 = vperm.slane %v708_v39, 0 }
 0x11e   :  { %v711_v46 = vsub.f32 %v709_v40, %v710_v42  ;;  %v715_v47 = vmul.f32 %v713_v45, %v2146_v15  ;;  %v716_v23 = vmul.f32 %v713_v45, %v2144_v13  ;;  %v717_v48 = vmul.f32 %v713_v45, %v2148_v16 }
 0x11f   :  { %v718_v49 = vmul.f32 %v713_v45, %v2153_v21  ;;  %v1875_v21 = vld [vmem:[#allocation3 + $0x250] sm:$0xff] }
 0x120   :  { %v720_v51 = vperm.slane %v711_v46, 0  ;;  %1905 = vmatpush.bf16.msra.mxu3 %v1875_v21  ;;  %1338 = vmatpush.bf16.msra.mxu1 %v1875_v21 }
 0x122   :  { %v722_v30 = vadd.f32 %v720_v51, %v715_v47  ;;  %v723_v53 = vadd.f32 %v720_v51, %v716_v23  ;;  %v724_v54 = vadd.f32 %v720_v51, %v717_v48  ;;  %v725_v55 = vadd.f32 %v720_v51, %v718_v49 }
 0x123   :  { %v1134_v23 = vrot.slane %v1132_v6, 5  ;;  %v1656_v6 = vrot.slane %v741_v56, 11 }
 0x124   :  { %v726_v33 = vmax.f32 %v722_v30, 0.0  ;;  %v727_v57 = vmax.f32 %v723_v53, 0.0  ;;  %v728_v15 = vmax.f32 %v724_v54, 0.0  ;;  %v729_v59 = vmax.f32 %v725_v55, 0.0  ;;  %1906 = vmatpush.bf16.msra.mxu3 %v1874_v0  ;;  %1339 = vmatpush.bf16.msra.mxu1 %v1874_v0 }
 0x126   :  { %v730_v13 = vpack.c.bf16 %v726_v33, %v726_v33  ;;  %v731_v16 = vpack.c.bf16 %v727_v57, %v727_v57  ;;  %v732_v60 = vpack.c.bf16 %v728_v15, %v728_v15  ;;  %v733_v61 = vpack.c.bf16 %v729_v59, %v729_v59 }
 0x128   :  { %734 = vst [vmem:[#allocation2 + $0x4] sm:$0xf] %v730_v13  ;;  %1907 = vmatpush.bf16.msra.mxu3 %v1873_v7  ;;  %1340 = vmatpush.bf16.msra.mxu1 %v1873_v7 }
 0x129   :  { %735 = vst [vmem:[#allocation2 + $0x8] sm:$0xf] %v731_v16  ;;  %v802_v16 = vshrl.u32 %v741_v56, 16 }
 0x12a   :  { %736 = vst [vmem:[#allocation2 + $0x14] sm:$0xf] %v732_v60 }
 0x12b   :  { %737 = vst [vmem:[#allocation2 + $0x18] sm:$0xf] %v733_v61  ;;  %v1622_v7 = vrot.slane %v802_v16, 11 }
 0x12f   :  { %v739_v4 = vld [vmem:[#allocation2 + $0x4] sm:$0xf] }
 0x130   :  { %v1090_v5 = vld [vmem:[#allocation2 + $0x4] sm:$0xf]  ;;  %v740_v9 = vld [vmem:[#allocation2 + $0x8] sm:$0x7]  ;;  %v906_v10 = vrot.slane %v739_v4, 7  ;;  %v785_v14 = vshrl.u32 %v739_v4, 16 }
 0x131   :  { %v1847_v8 = vld [vmem:[#allocation2 + $0x4] sm:$0xff]  ;;  %v909_v12 = vrot.slane %v740_v9, 7  ;;  %v788_v17 = vshll.u32 %v739_v4, 16  ;;  %v1113_v26 = vshrl.u32 %v1090_v5, 16  ;;  %v1116_v29 = vshll.u32 %v1090_v5, 16 }
 0x132   :  { %v761_v11 = vld [vmem:[#allocation2 + $0x8] sm:$0xf]  ;;  %1075 = vmatmul.bf16.vlgmr.msrb.gmra.mxu3 %v1847_v8  ;;  %v907_v20 = vsel %vm2027_vm6, %v1655_v1, %v906_v10  ;;  %v908_v22 = vrot.slane %v906_v10, 4  ;;  %v787_v27 = vrot.slane %v785_v14, 7  ;;  %v742_v37 = vld [vmem:[#allocation2 + $0x14] sm:$0xf] }
 0x133   :  { %v794_v18 = vshrl.u32 %v761_v11, 16  ;;  %v2210_v19 = vld [vmem:[#allocation2 + $0x8] sm:$0xf]  ;;  %v797_v25 = vshll.u32 %v761_v11, 16  ;;  %v918_v24 = vunpack.c.l.b16 %v907_v20  ;;  %v1115_v35 = vrot.slane %v1113_v26, 4 }
 0x134   :  { %v910_v32 = vsel %vm2027_vm6, %v908_v22, %v909_v12  ;;  %v1122_v36 = vshll.u32 %v2210_v19, 16  ;;  %v1126_v44 = vshrl.u32 %v2210_v19, 16  ;;  %v790_v40 = vor.u32 %v788_v17, %v787_v27  ;;  %v762_v55 = vld [vmem:[#allocation2 + $0x18] sm:$0xf]  ;;  %v1093_v5 = vld [vmem:[#allocation2 + $0x14] sm:$0xf] }
 0x135   :  { %v796_v31 = vrot.slane %v794_v18, 7  ;;  %v919_v39 = vunpack.c.l.b16 %v910_v32  ;;  %v792_v41 = vrot.slane %v787_v27, 4  ;;  %v1118_v45 = vrot.slane %v1116_v29, 5  ;;  %v743_v13 = vld [vmem:[#allocation2 + $0x18] sm:$0x7] }
 0x136   :  { %v1124_v46 = vrot.slane %v1122_v36, 5  ;;  %v1128_v47 = vrot.slane %v1126_v44, 4  ;;  %v791_v34 = vsel %vm2039_vm7, %v1621_v2, %v790_v40  ;;  %v913_v51 = vrot.slane %v742_v37, 7  ;;  %v1094_v4 = vld [vmem:[#allocation2 + $0x18] sm:$0xf] }
 0x137   :  { %v799_v42 = vor.u32 %v797_v25, %v796_v31  ;;  %v922_v48 = vpack.c.b16 %v919_v39, %v918_v24  ;;  %v823_v52 = vunpack.c.l.b16 %v791_v34  ;;  %v1119_v53 = vor.u32 %v1118_v45, %v1115_v35  ;;  %v1848_v17 = vld [vmem:[#allocation2 + $0x14] sm:$0xff]  ;;  %v1095_v27 = vld [vmem:[#allocation2 + $0x1c] sm:$0x1] }
 0x138   :  { %v1129_v54 = vor.u32 %v1128_v47, %v1124_v46  ;;  %v807_v33 = vshrl.u32 %v742_v37, 16  ;;  %v915_v60 = vrot.slane %v913_v51, 4  ;;  %v816_v61 = vshrl.u32 %v762_v55, 16  ;;  %v1240_v36 = vld [vmem:[#allocation2 + $0x14] sm:$0xe] }
 0x139   :  { %v800_v49 = vsel %vm2039_vm7, %v792_v41, %v799_v42  ;;  %982 = vmatmul.bf16.vlgmr.msrb.gmra.mxu2 %v922_v48  ;;  %v1120_v15 = vrot.slane %v1119_v53, 4  ;;  %v916_v1 = vrot.slane %v743_v13, 7  ;;  %v810_v2 = vshll.u32 %v742_v37, 16 }
 0x13a   :  { %v824_v30 = vunpack.c.l.b16 %v800_v49  ;;  %v1130_v59 = vrot.slane %v1129_v54, 4  ;;  %v809_v21 = vrot.slane %v807_v33, 7  ;;  %v818_v8 = vrot.slane %v816_v61, 7 }
 0x13b   :  { %v1125_v38 = vsel %vm2050_vm8, %v1120_v15, %v1124_v46  ;;  %v819_v9 = vshll.u32 %v762_v55, 16  ;;  %v917_v11 = vsel %vm2027_vm6, %v915_v60, %v916_v1  ;;  %v1137_v20 = vshrl.u32 %v1093_v5, 16 }
 0x13c   :  { %v827_v57 = vpack.c.b16 %v824_v30, %v823_v52  ;;  %v1135_v62 = vsel %vm2050_vm8, %v1130_v59, %v1134_v23  ;;  %v1160_v63 = vunpack.c.l.b16 %v1125_v38  ;;  %v812_v12 = vor.u32 %v810_v2, %v809_v21 }
 0x13d   :  { %v1161_v0 = vunpack.c.l.b16 %v1135_v62  ;;  %v814_v14 = vrot.slane %v809_v21, 4  ;;  %v821_v18 = vor.u32 %v819_v9, %v818_v8  ;;  %v1140_v22 = vshll.u32 %v1093_v5, 16 }
 0x13e   :  { %887 = vmatmul.bf16.vlgmr.msrb.gmra.mxu1 %v827_v57  ;;  %v1146_v25 = vshll.u32 %v1094_v4, 16  ;;  %v1272_v26 = vrot.slane %v1094_v4, 5  ;;  %v914_v24 = vsel %vm2027_vm6, %v1656_v6, %v913_v51  ;;  %v1150_v31 = vshrl.u32 %v1094_v4, 16  ;;  %v1239_v57 = vld [vmem:[#allocation2 + $0x4] sm:$0xe] }
 0x13f   :  { %v1164_v10 = vpack.c.b16 %v1161_v0, %v1160_v63  ;;  %v921_v29 = vunpack.c.l.b16 %v917_v11  ;;  %v813_v32 = vsel %vm2039_vm7, %v1622_v7, %v812_v12  ;;  %v822_v35 = vsel %vm2039_vm7, %v814_v14, %v821_v18 }
 0x140   :  { %v1139_v44 = vrot.slane %v1137_v20, 4  ;;  %v1142_v37 = vrot.slane %v1140_v22, 5  ;;  %v1148_v39 = vrot.slane %v1146_v25, 5  ;;  %v1152_v40 = vrot.slane %v1150_v31, 4 }
 0x141   :  { %1224 = vmatmul.bf16.vlgmr.msra.gmra.mxu0 %v1164_v10  ;;  %v920_v41 = vunpack.c.l.b16 %v914_v24  ;;  %v1274_v42 = vrot.slane %v1272_v26, 4  ;;  %v1275_v45 = vrot.slane %v1095_v27, 5  ;;  %v825_v46 = vunpack.c.l.b16 %v813_v32 }
 0x142   :  { %1080 = vmatmul.bf16.gmra.mxu3 %v1848_v17  ;;  %v826_v43 = vunpack.c.l.b16 %v822_v35  ;;  %v1762_v23 = vrot.slane %v1240_v36, 9  ;;  %v1143_v48 = vor.u32 %v1142_v37, %v1139_v44  ;;  %v1153_v34 = vor.u32 %v1152_v40, %v1148_v39 }
 0x143   :  { %v923_v47 = vpack.c.b16 %v921_v29, %v920_v41  ;;  %v1156_v49 = vshll.u32 %v1095_v27, 16  ;;  %v1276_v50 = vsel %vm2127_vm11, %v1274_v42, %v1275_v45  ;;  %v1265_v30 = vrot.slane %v2210_v19, 5 }
 0x144   :  { %v828_v51 = vpack.c.b16 %v826_v43, %v825_v46  ;;  %v1273_v52 = vsel %vm2127_vm11, %v1762_v23, %v1272_v26  ;;  %v1280_v53 = vunpack.c.l.b16 %v1276_v50  ;;  %v1144_v54 = vrot.slane %v1143_v48, 4 }
 0x145   :  { %v1154_v55 = vrot.slane %v1153_v34, 4  ;;  %v1158_v56 = vrot.slane %v1156_v49, 5  ;;  %v1279_v33 = vunpack.c.l.b16 %v1273_v52  ;;  %v1267_v15 = vrot.slane %v1265_v30, 4 }
 0x146   :  { %v1268_v59 = vrot.slane %v2206_v3, 5  ;;  %v1149_v16 = vsel %vm2050_vm8, %v1144_v54, %v1148_v39  ;;  %v1761_v21 = vrot.slane %v1239_v57, 9 }
 0x147   :  { %v1282_v13 = vpack.c.b16 %v1280_v53, %v1279_v33  ;;  %v1159_v60 = vsel %vm2050_vm8, %v1154_v55, %v1158_v56  ;;  %v1162_v19 = vunpack.c.l.b16 %v1149_v16 }
 0x148   :  { %v1163_v61 = vunpack.c.l.b16 %v1159_v60  ;;  %v1269_v38 = vsel %vm2127_vm11, %v1267_v15, %v1268_v59  ;;  %v1266_v62 = vsel %vm2127_vm11, %v1761_v21, %v1265_v30 }
 0x149   :  { %987 = vmatmul.bf16.gmra.mxu2 %v923_v47  ;;  %v1278_v63 = vunpack.c.l.b16 %v1269_v38  ;;  %v1277_v3 = vunpack.c.l.b16 %v1266_v62 }
 0x14a   :  { %v1165_v0 = vpack.c.b16 %v1163_v61, %v1162_v19 }
 0x14b   :  { %v1281_v1 = vpack.c.b16 %v1278_v63, %v1277_v3 }
 0x14e   :  { %892 = vmatmul.bf16.gmra.mxu1 %v828_v51 }
 0x152   :  { %1346 = vmatmul.bf16.vlgmr.msra.gmra.mxu3 %v1282_v13 }
 0x159   :  { %1229 = vmatmul.bf16.vlgmr.msra.gmra.mxu2 %v1165_v0 }
 0x15e   :  { %1341 = vmatmul.bf16.vlgmr.msra.gmra.mxu1 %v1281_v1 }
 0x1b5   :  { %v1076_v2 = vpop.f32.mrf.mxu3 }
 0x1bb   :  { %v888_v4 = vpop.f32.mrf.mxu1 }
 0x1bc   :  { %v983_v58 = vpop.f32.mrf.mxu2 }
 0x1bd   :  { %v1078_v5 = vpop.f32.mrf.mxu3  ;;  %v984_v17 = vadd.f32 %v983_v58, %v888_v4 }
 0x1be   :  { %v1225_v28 = vpop.f32.mrf.mxu0 }
 0x1bf   :  { %v1086_v25 = vadd.f32 %v1076_v2, %v984_v17 }
 0x1c1   :  { %v1235_v35 = vadd.f32 %v1225_v28, %v1086_v25 }
 0x1c3   :  { %v890_v6 = vpop.f32.mrf.mxu1 }
 0x1c4   :  { %v985_v7 = vpop.f32.mrf.mxu2 }
 0x1c5   :  { %v1081_v8 = vpop.f32.mrf.mxu3  ;;  %v986_v18 = vadd.f32 %v985_v7, %v890_v6 }
 0x1c6   :  { %v1227_v31 = vpop.f32.mrf.mxu0 }
 0x1c7   :  { %v1087_v26 = vadd.f32 %v1078_v5, %v986_v18 }
 0x1c9   :  { %v1236_v36 = vadd.f32 %v1227_v31, %v1087_v26 }
 0x1cb   :  { %v893_v9 = vpop.f32.mrf.mxu1 }
 0x1cc   :  { %v988_v10 = vpop.f32.mrf.mxu2 }
 0x1cd   :  { %v1083_v12 = vpop.f32.mrf.mxu3  ;;  %v989_v22 = vadd.f32 %v988_v10, %v893_v9 }
 0x1cf   :  { %v1088_v32 = vadd.f32 %v1081_v8, %v989_v22  ;;  %v1795_v8 = vld [vmem:[%s2264_s2 + $0x1] sm:$0x1]  ;;  %s1973_s2 = smov [#allocation6]  }
 0x1d0   :  { %s1432_s13 = sshll.u32 %s1973_s2, 4  ;;  %s1433_s13 = int_to_ptr.vmem [resolvable:$true] %s1432_s13 }
 0x1d3   :  { %v895_v11 = vpop.f32.mrf.mxu1 }
 0x1d4   :  { %v990_v14 = vpop.f32.mrf.mxu2 }
 0x1d5   :  { %v1347_v24 = vpop.f32.mrf.mxu3  ;;  %v991_v29 = vadd.f32 %v990_v14, %v895_v11 }
 0x1d7   :  { %v1089_v41 = vadd.f32 %v1083_v12, %v991_v29  ;;  %v1796_v12 = vld [vmem:[%s2265_s3 + $0x1] sm:$0x1] }
 0x1db   :  { %v1342_v20 = vpop.f32.mrf.mxu1 }
 0x1dc   :  { %v1230_v27 = vpop.f32.mrf.mxu2  ;;  %v1352_v39 = vadd.f32 %v1342_v20, %v1235_v35 }
 0x1dd   :  { %v1237_v44 = vadd.f32 %v1230_v27, %v1088_v32  ;;  %v1349_v47 = vpop.f32.mrf.mxu3 }
 0x1df   :  { %v1354_v46 = vadd.f32 %v1347_v24, %v1237_v44 }
 0x1e3   :  { %v1344_v37 = vpop.f32.mrf.mxu1 }
 0x1e4   :  { %v1353_v40 = vadd.f32 %v1344_v37, %v1236_v36  ;;  %v1232_v45 = vpop.f32.mrf.mxu2 }
 0x1e5   :  { %v1238_v43 = vadd.f32 %v1232_v45, %v1089_v41 }
 0x1e6   :  { %v1356_v42 = vadd.f32 %v1353_v40, %v1352_v39 }
 0x1e7   :  { %v1355_v48 = vadd.f32 %v1349_v47, %v1238_v43 }
 0x1e8   :  { %v1357_v23 = vadd.f32 %v1356_v42, %v1354_v46 }
 0x1ea   :  { %v1358_v34 = vadd.f32 %v1357_v23, %v1355_v48 }
 0x1ec   :  { %v1359_v49 = vrot.slane %v1358_v34, 4 }
 0x1ee   :  { %v1360_v50 = vadd.f32 %v1359_v49, %v1358_v34 }
 0x1f0   :  { %v1361_v51 = vrot.slane %v1360_v50, 2 }
 0x1f2   :  { %v1362_v52 = vadd.f32 %v1361_v51, %v1360_v50 }
 0x1f4   :  { %v1363_v30 = vrot.slane %v1362_v52, 1 }
 0x1f6   :  { %v1364_v53 = vadd.f32 %v1363_v30, %v1362_v52 }
 0x1f8   :  { %v1365_v54 = vmul.f32 0.03125, %v1364_v53 }
 0x1fa   :  { %v1366_v55 = vsub.f32 %v1352_v39, %v1365_v54  ;;  %v1367_v56 = vsub.f32 %v1353_v40, %v1365_v54  ;;  %v1368_v33 = vsub.f32 %v1354_v46, %v1365_v54  ;;  %v1369_v57 = vsub.f32 %v1355_v48, %v1365_v54 }
 0x1fc   :  { %v1370_v15 = vmul.f32 %v1366_v55, %v1366_v55  ;;  %v1371_v59 = vmul.f32 %v1367_v56, %v1367_v56  ;;  %v1372_v13 = vmul.f32 %v1368_v33, %v1368_v33  ;;  %v1373_v60 = vmul.f32 %v1369_v57, %v1369_v57 }
 0x1fe   :  { %v1374_v16 = vadd.f32 %v1371_v59, %v1370_v15 }
 0x200   :  { %v1375_v21 = vadd.f32 %v1374_v16, %v1372_v13 }
 0x202   :  { %v1376_v19 = vadd.f32 %v1375_v21, %v1373_v60 }
 0x204   :  { %v1377_v61 = vrot.slane %v1376_v19, 4 }
 0x206   :  { %v1378_v38 = vadd.f32 %v1377_v61, %v1376_v19 }
 0x208   :  { %v1379_v62 = vrot.slane %v1378_v38, 2 }
 0x20a   :  { %v1380_v63 = vadd.f32 %v1379_v62, %v1378_v38 }
 0x20c   :  { %v1381_v0 = vrot.slane %v1380_v63, 1 }
 0x20e   :  { %v1382_v3 = vadd.f32 %v1381_v0, %v1380_v63 }
 0x210   :  { %v1383_v1 = vmul.f32 0.03125, %v1382_v3 }
 0x212   :  { %v1386_v2 = vadd.f32 1e-05, %v1383_v1 }
 0x214   :  { %1915 = vrsqrt.f32 %v1386_v2  ;;  %vm1393_vm0 = vweird.f32 %v1386_v2 }
 0x21a   :  { %v1916_v4 = vpop.eup %1915 }
 0x21b   :  { %v1388_v58 = vmul.f32 %v1916_v4, %v1386_v2  ;;  %vm1394_vm15 = vweird.f32 %v1916_v4 }
 0x21c   :  { %vm1395_vm1 = vmor %vm1393_vm0, %vm1394_vm15 }
 0x21d   :  { %v1389_v5 = vmul.f32 %v1916_v4, %v1388_v58 }
 0x21f   :  { %v1390_v6 = vmul.f32 0.5, %v1389_v5 }
 0x221   :  { %v1391_v7 = vsub.f32 1.5, %v1390_v6 }
 0x223   :  { %v1392_v9 = vmul.f32 %v1916_v4, %v1391_v7 }
 0x225   :  { %v1396_v10 = vsel %vm1395_vm1, %v1916_v4, %v1392_v9 }
 0x226   :  { %v1397_v11 = vmul.f32 %v1795_v8, %v1396_v10 }
 0x228   :  { %v1400_v14 = vmul.f32 %v1397_v11, %v1365_v54  ;;  %v1403_v28 = vperm.slane %v1397_v11, 0 }
 0x22a   :  { %v1401_v17 = vsub.f32 %v1796_v12, %v1400_v14  ;;  %v1408_v18 = vmul.f32 %v1403_v28, %v1355_v48  ;;  %v1405_v22 = vmul.f32 %v1403_v28, %v1352_v39  ;;  %v1406_v25 = vmul.f32 %v1403_v28, %v1353_v40 }
 0x22b   :  { %v1407_v26 = vmul.f32 %v1403_v28, %v1354_v46 }
 0x22c   :  { %v1410_v20 = vperm.slane %v1401_v17, 0 }
 0x22e   :  { %v1415_v24 = vadd.f32 %v1410_v20, %v1408_v18  ;;  %v1412_v27 = vadd.f32 %v1410_v20, %v1405_v22  ;;  %v1413_v31 = vadd.f32 %v1410_v20, %v1406_v25  ;;  %v1414_v29 = vadd.f32 %v1410_v20, %v1407_v26 }
 0x230   :  { %v1419_v32 = vmax.f32 %v1415_v24, 0.0  ;;  %v1416_v35 = vmax.f32 %v1412_v27, 0.0  ;;  %v1417_v36 = vmax.f32 %v1413_v31, 0.0  ;;  %v1418_v44 = vmax.f32 %v1414_v29, 0.0 }
 0x232   :  { %v1884_v37 = vpack.c.bf16 %v1417_v36, %v1416_v35  ;;  %v1889_v41 = vpack.c.bf16 %v1419_v32, %v1418_v44 }
 0x234   :  { %1885 = vst [vmem:[#allocation6] sm:$0xff] %v1884_v37  }
 0x235   :  { %1891 = vst [vmem:[#allocation6 + $0x8] sm:$0xff] %v1889_v41  }
 0x236   :  { %1440 = dma.vmem_to_hbm [thread:$0]  %s1433_s13, 256, %s1435_s15, [#allocation5], %s1970_s20, %s1970_s20, %s1971_s21  }
 0x237   :  { %1967 = dma.done.wait [#allocation5], 256  }
 0x238   :  { %1968 = vsyncadd [#allocation5], 4294967040 }
 0x239   :  { %1445 = vsyncpa [#allocation4], 1 }
 0x23a   :  { %1446 = vsyncpa [#allocation5], 1 }

</bundles_post_ra>
